<compile_context>
chip_gen: v7x
topology: tpu7x:2x2x1
jax: 0.10.0
libtpu: 0.0.40
codegen_flags: <defaults>
</compile_context>

<pallas_src>
import functools

import jax
import jax.numpy as jnp
from jax.experimental import pallas as pl
from jax.experimental.pallas import tpu as pltpu


def _round_up(x, m):
    return (x + m - 1) // m * m


def _cdiv(a, b):
    return (a + b - 1) // b


# ------------------ one-time chip detection (safe fallbacks) -----------------
def _detect_chip_tuning():
    """Returns (force_two_m_tiles, tn_max)."""
    force_two_m_tiles = False
    tn_max = 1024
    try:
        # v7x has 2 TensorCores sharded over the 'parallel' grid axis; make
        # sure there are >=2 M tiles so the second core isn't idle.
        kind = jax.devices()[0].device_kind.lower()
        if "v7" in kind or "7x" in kind:
            force_two_m_tiles = True
    except Exception:
        pass
    try:
        # 128-MiB-VMEM parts (v5e/v6e) can afford wider W2 tiles (fewer j
        # steps / deeper effective buffering of the HBM-bound W2 stream).
        vmem_bytes = getattr(pltpu.get_tpu_info(), "vmem_capacity_bytes", 0)
        if vmem_bytes and vmem_bytes >= (100 << 20):
            tn_max = 2048
    except Exception:
        pass
    return force_two_m_tiles, tn_max


_FORCE_TWO_M_TILES, _TN_MAX = _detect_chip_tuning()


# ------------------------------- Pallas kernel -------------------------------
def _two_layer_mlp_kernel(x_ref, w1_ref, b1_ref, w2_ref, b2_ref, o_ref, h_ref):
    """One (TM, TN) output tile of  y = (x @ W1 + b1) @ W2 + b2.

    grid = (M_tiles, N_tiles).  INVARIANT: the N axis (program_id(1)) must be
    the innermost, sequentially iterated ('arbitrary') axis on each core — the
    hidden activation for the current M tile is computed once at j == 0 into
    the persistent VMEM scratch `h_ref` and reused for every N tile.  Do NOT
    mark it 'parallel' or reorder the grid.
    """
    @pl.when(pl.program_id(1) == 0)
    def _():
        # Cast x to bf16 in-kernel (no standalone XLA cast pass over HBM).
        x = x_ref[...].astype(jnp.bfloat16)
        h = jnp.dot(x, w1_ref[...], preferred_element_type=jnp.float32)
        h_ref[...] = (h + b1_ref[...]).astype(h_ref.dtype)

    y = jnp.dot(h_ref[...], w2_ref[...], preferred_element_type=jnp.float32)
    o_ref[...] = (y + b2_ref[...]).astype(o_ref.dtype)


def two_layer_mlp(x2d, w1, b1_2d, w2, b2_2d, *, out_dtype=jnp.float32,
                  tm_max=256, tn_max=None):
    """x2d:[M,D] f32; w1:[D,D] bf16; b1_2d:[1,D] f32; w2:[D,N] bf16;
    b2_2d:[1,N] f32  ->  [M, N] out_dtype.  bf16 MXU with f32 accumulation."""
    M, D = x2d.shape
    N = w2.shape[1]
    if tn_max is None:
        tn_max = _TN_MAX

    # TM: multiple of 16 (bf16 sublane packing of the hidden scratch), chosen
    # to minimize row padding; on 2-TC chips ensure >=2 M tiles so both cores
    # get work (M stays the 'parallel' axis).
    n_m_tiles = max(1, _cdiv(M, tm_max))
    if _FORCE_TWO_M_TILES and M >= 32:
        n_m_tiles = max(2, n_m_tiles)
    TM = min(_round_up(tm_max, 16), _round_up(_cdiv(M, n_m_tiles), 16))
    grid_m = _cdiv(M, TM)

    # TN: whole N if it fits one tile (a full-dim block is always legal),
    # otherwise a lane-dense multiple of 128.  The last j tile may be ragged:
    # Pallas masks edge loads/stores, so no pad / slice copies are needed.
    TN = N if N <= tn_max else tn_max
    grid_n = _cdiv(N, TN)

    return pl.pallas_call(
        _two_layer_mlp_kernel,
        out_shape=jax.ShapeDtypeStruct((M, N), out_dtype),
        grid=(grid_m, grid_n),
        in_specs=[
            pl.BlockSpec((TM, D), lambda i, j: (i, 0)),          # x   (f32)
            # W1 / b1 never change across the grid: keep them resident in VMEM
            # as whole arrays (single buffer, one DMA) instead of
            # double-buffered tiles.
            pl.BlockSpec(memory_space=pltpu.MemorySpace.VMEM),   # W1  (bf16)
            pl.BlockSpec(memory_space=pltpu.MemorySpace.VMEM),   # b1  (f32)
            pl.BlockSpec((D, TN), lambda i, j: (0, j)),          # W2  (bf16)
            pl.BlockSpec((1, TN), lambda i, j: (0, j)),          # b2  (f32)
        ],
        out_specs=pl.BlockSpec((TM, TN), lambda i, j: (i, j)),
        scratch_shapes=[pltpu.VMEM((TM, D), jnp.bfloat16)],      # h per M tile
        compiler_params=pltpu.CompilerParams(
            # M tiles are independent -> 'parallel' (sharded across v7x's two
            # TensorCores).  N MUST stay the innermost 'arbitrary' axis: the
            # hidden scratch written at j == 0 is reused for every j.
            dimension_semantics=("parallel", "arbitrary"),
            # Below v7x's 64 MiB physical VMEM; ample headroom everywhere.
            vmem_limit_bytes=48 << 20,
        ),
    )(x2d, w1, b1_2d, w2, b2_2d)


@functools.partial(jax.jit, static_argnames=("out_dtype",))
def _apply_head(x3d, w1, b1_2d, w2, b2_2d, *, out_dtype=jnp.float32):
    """One fused dispatch per column: reshape -> kernel -> reshape."""
    B, S, D = x3d.shape
    y2d = two_layer_mlp(x3d.reshape(B * S, D), w1, b1_2d, w2, b2_2d,
                        out_dtype=out_dtype)
    return y2d.reshape(B, S, w2.shape[1])


# ---------------------------- Module-level wrapper ----------------------------
class OutputPallas:
    """JAX/Pallas port of the PyTorch `Output` module (a ModuleDict of
    Linear(d, d) -> Linear(d, out_dim) heads, one per column)."""

    def __init__(self, config, label_encoder_dict, d_model, key,
                 out_dtype=jnp.float32):
        self.temporal_cols = config["temporal_cols"]
        self.img_cols = config["img_cols"]
        self.nlp_cols = config["nlp_cols"]
        self.d_model = d_model
        # f32 keeps torch semantics; bf16 halves the dominant output-writeback
        # HBM stream of the 30522-wide vocab head if acceptable downstream.
        self.out_dtype = out_dtype

        # Output dim per column (mirrors the torch module's __init__).
        out_dims = {}
        for col in self.temporal_cols:
            if col in config["scaling_cols"]:
                out_dims[col] = 1
            elif col in config["embedding_cols"]:
                out_dims[col] = label_encoder_dict[col]["num_cls"]
        for col in self.img_cols:
            out_dims[col] = 3 * config["patch_size"] * config["patch_size"]
        for col in self.nlp_cols:
            out_dims[col] = 30522
        self.out_dims = out_dims

        # Deterministic synthetic init.  PyTorch Linear stores W as [out, in];
        # transpose to [in, out].  All casts / transposes / bias reshapes are
        # done ONCE here so the per-call path is a single jit'd dispatch.
        # Weights are bf16 (halves the HBM W2 stream); biases stay f32.
        self.params = {}
        for col, n_out in out_dims.items():
            key, k1, k2, k3, k4 = jax.random.split(key, 5)
            w1_oi = jax.random.normal(k1, (d_model, d_model), jnp.float32) * (
                1.0 / jnp.sqrt(d_model))
            b1 = jax.random.normal(k2, (d_model,), jnp.float32) * 0.02
            w2_oi = jax.random.normal(k3, (n_out, d_model), jnp.float32) * (
                1.0 / jnp.sqrt(d_model))
            b2 = jax.random.normal(k4, (n_out,), jnp.float32) * 0.02
            self.params[col] = dict(
                w1=jnp.transpose(w1_oi).astype(jnp.bfloat16),   # [D, D]  bf16
                b1=b1.reshape(1, d_model),                      # [1, D]  f32
                w2=jnp.transpose(w2_oi).astype(jnp.bfloat16),   # [D, N]  bf16
                b2=b2.reshape(1, n_out),                        # [1, N]  f32
            )
        # TODO(synk): tiny heads (out_dim 1/5/12) could be batched into one
        # launch (stack weights along a leading grid axis) or algebraically
        # fused (W1@W2, b1@W2+b2); kept as separate launches for ModuleDict
        # parity and exact two-matmul numerics.

    def __call__(self, data_dict, mode=None):
        result_dict = {}
        for col in self.temporal_cols + self.img_cols + self.nlp_cols:
            p = self.params[col]
            result_dict[col] = _apply_head(
                data_dict[col], p["w1"], p["b1"], p["w2"], p["b2"],
                out_dtype=self.out_dtype)
        return result_dict

    # Pure-JAX reference mirroring the kernel numerics (bf16 operands, f32
    # accumulation, bf16-rounded hidden).  NOTE: torch runs these Linears in
    # full f32 — confirm bf16 weights / hidden are acceptable downstream.
    def reference(self, data_dict):
        out = {}
        for col in self.temporal_cols + self.img_cols + self.nlp_cols:
            x = data_dict[col]
            p = self.params[col]
            h = jnp.einsum("bsd,de->bse", x.astype(jnp.bfloat16), p["w1"],
                           preferred_element_type=jnp.float32) + p["b1"]
            h = h.astype(jnp.bfloat16)
            y = jnp.einsum("bsd,dn->bsn", h, p["w2"],
                           preferred_element_type=jnp.float32) + p["b2"]
            out[col] = y.astype(self.out_dtype)
        return out


# ------------------------------------ Demo ------------------------------------
if __name__ == "__main__":
    config = dict(
        temporal_cols=["price", "category"],
        img_cols=["image"],
        nlp_cols=["text"],
        scaling_cols=["price"],
        embedding_cols=["category"],
        patch_size=2,
    )
    label_encoder_dict = {"category": {"num_cls": 5}}
    d_model = 32
    B, S = 2, 8

    key = jax.random.PRNGKey(0)
    key, pkey = jax.random.split(key)
    model = OutputPallas(config, label_encoder_dict, d_model, pkey)

    data_dict = {}
    for col in config["temporal_cols"] + config["img_cols"] + config["nlp_cols"]:
        key, dkey = jax.random.split(key)
        data_dict[col] = jax.random.normal(dkey, (B, S, d_model), jnp.float32)

    result = model(data_dict, mode="train")
    result = jax.block_until_ready(result)

    ref = model.reference(data_dict)
    for col in result:
        assert result[col].shape == ref[col].shape, col
        assert jnp.allclose(result[col], ref[col], atol=1e-2, rtol=1e-2), (
            col,
            float(jnp.max(jnp.abs(result[col] - ref[col]))),
        )

    print("KERNEL_OK")
</pallas_src>

<mosaic_0001>
module attributes {stable_mosaic.version = 11 : i64} {
  func.func @_two_layer_mlp_kernel(%arg0: i32, %arg1: i32, %arg2: memref<16x32xf32, #tpu.memory_space<vmem>>, %arg3: memref<32x32xbf16, #tpu.memory_space<vmem>>, %arg4: memref<1x32xf32, #tpu.memory_space<vmem>>, %arg5: memref<32x1xbf16, #tpu.memory_space<vmem>>, %arg6: memref<1x1xf32, #tpu.memory_space<vmem>>, %arg7: memref<16x1xf32, #tpu.memory_space<vmem>>, %arg8: memref<16x32xbf16, #tpu.memory_space<vmem>>) attributes {dimension_semantics = [#tpu.dimension_semantics<parallel>, #tpu.dimension_semantics<arbitrary>], iteration_bounds = array<i64: 1, 1>, scalar_prefetch = 0 : i64, scratch_operands = 1 : i64, tpu.core_type = #tpu.core_type<tc>, window_params = [{transform_indices = @transform_0, window_bounds = array<i64: 16, 32>}, {pipeline_mode = #tpu.pipeline_mode<synchronous>, transform_indices = @transform_1, window_bounds = array<i64: 32, 32>}, {pipeline_mode = #tpu.pipeline_mode<synchronous>, transform_indices = @transform_2, window_bounds = array<i64: 1, 32>}, {transform_indices = @transform_3, window_bounds = array<i64: 32, 1>}, {transform_indices = @transform_4, window_bounds = array<i64: 1, 1>}, {transform_indices = @transform_5, window_bounds = array<i64: 16, 1>}]} {
    %c0_i32 = arith.constant 0 : i32
    %0 = arith.cmpi eq, %arg1, %c0_i32 : i32
    %1 = arith.extui %0 : i1 to i32
    %c0_i32_0 = arith.constant 0 : i32
    %2 = arith.cmpi ne, %1, %c0_i32_0 : i32
    scf.if %2 {
      %c0_8 = arith.constant 0 : index
      %c0_9 = arith.constant 0 : index
      %10 = vector.load %arg2[%c0_8, %c0_9] : memref<16x32xf32, #tpu.memory_space<vmem>>, vector<16x32xf32>
      %11 = arith.truncf %10 : vector<16x32xf32> to vector<16x32xbf16>
      %c0_10 = arith.constant 0 : index
      %c0_11 = arith.constant 0 : index
      %12 = vector.load %arg3[%c0_10, %c0_11] : memref<32x32xbf16, #tpu.memory_space<vmem>>, vector<32x32xbf16>
      %cst_12 = arith.constant dense<0.000000e+00> : vector<16x32xf32>
      %13 = tpu.matmul %11, %12, %cst_12 {dimension_numbers = #tpu.dot_dimension_numbers<[1], [0], [0], [1], [0, 0, 1, 1], [], []>} : vector<16x32xbf16>, vector<32x32xbf16>, vector<16x32xf32> -> vector<16x32xf32>
      %c0_13 = arith.constant 0 : index
      %c0_14 = arith.constant 0 : index
      %14 = vector.load %arg4[%c0_13, %c0_14] : memref<1x32xf32, #tpu.memory_space<vmem>>, vector<1x32xf32>
      %15 = vector.broadcast %14 : vector<1x32xf32> to vector<16x32xf32>
      %16 = arith.addf %13, %15 : vector<16x32xf32>
      %17 = arith.truncf %16 : vector<16x32xf32> to vector<16x32xbf16>
      %c0_15 = arith.constant 0 : index
      %c0_16 = arith.constant 0 : index
      %18 = vector.load %arg8[%c0_15, %c0_16] : memref<16x32xbf16, #tpu.memory_space<vmem>>, vector<16x32xbf16>
      tpu.vector_store %arg8[%c0_15, %c0_16], %17 {strides = array<i32>} : memref<16x32xbf16, #tpu.memory_space<vmem>>, vector<16x32xbf16>,
    } else {
    }
    %c0 = arith.constant 0 : index
    %c0_1 = arith.constant 0 : index
    %3 = vector.load %arg8[%c0, %c0_1] : memref<16x32xbf16, #tpu.memory_space<vmem>>, vector<16x32xbf16>
    %c0_2 = arith.constant 0 : index
    %c0_3 = arith.constant 0 : index
    %4 = vector.load %arg5[%c0_2, %c0_3] : memref<32x1xbf16, #tpu.memory_space<vmem>>, vector<32x1xbf16>
    %cst = arith.constant dense<0.000000e+00> : vector<16x1xf32>
    %5 = tpu.matmul %3, %4, %cst {dimension_numbers = #tpu.dot_dimension_numbers<[1], [0], [0], [1], [0, 0, 1, 1], [], []>} : vector<16x32xbf16>, vector<32x1xbf16>, vector<16x1xf32> -> vector<16x1xf32>
    %c0_4 = arith.constant 0 : index
    %c0_5 = arith.constant 0 : index
    %6 = vector.load %arg6[%c0_4, %c0_5] : memref<1x1xf32, #tpu.memory_space<vmem>>, vector<1x1xf32>
    %7 = vector.broadcast %6 : vector<1x1xf32> to vector<16x1xf32>
    %8 = arith.addf %5, %7 : vector<16x1xf32>
    %c0_6 = arith.constant 0 : index
    %c0_7 = arith.constant 0 : index
    %9 = vector.load %arg7[%c0_6, %c0_7] : memref<16x1xf32, #tpu.memory_space<vmem>>, vector<16x1xf32>
    tpu.vector_store %arg7[%c0_6, %c0_7], %8 {strides = array<i32>} : memref<16x1xf32, #tpu.memory_space<vmem>>, vector<16x1xf32>,
    return
  }
  func.func @transform_0(%arg0: i32, %arg1: i32) -> (i32, i32) {
    %c0_i32 = arith.constant 0 : i32
    %c0_i32_0 = arith.constant 0 : i32
    return %arg0, %c0_i32 : i32, i32
  }
  func.func @transform_1(%arg0: i32, %arg1: i32) -> (i32, i32) {
    %c0_i32 = arith.constant 0 : i32
    %c0_i32_0 = arith.constant 0 : i32
    %c0_i32_1 = arith.constant 0 : i32
    return %c0_i32, %c0_i32_0 : i32, i32
  }
  func.func @transform_2(%arg0: i32, %arg1: i32) -> (i32, i32) {
    %c0_i32 = arith.constant 0 : i32
    %c0_i32_0 = arith.constant 0 : i32
    %c0_i32_1 = arith.constant 0 : i32
    return %c0_i32, %c0_i32_0 : i32, i32
  }
  func.func @transform_3(%arg0: i32, %arg1: i32) -> (i32, i32) {
    %c0_i32 = arith.constant 0 : i32
    %c0_i32_0 = arith.constant 0 : i32
    return %c0_i32, %arg1 : i32, i32
  }
  func.func @transform_4(%arg0: i32, %arg1: i32) -> (i32, i32) {
    %c0_i32 = arith.constant 0 : i32
    %c0_i32_0 = arith.constant 0 : i32
    return %c0_i32, %arg1 : i32, i32
  }
  func.func @transform_5(%arg0: i32, %arg1: i32) -> (i32, i32) {
    %c0_i32 = arith.constant 0 : i32
    return %arg0, %arg1 : i32, i32
  }
}

</mosaic_0001>

<bundles_post_ra>
// kernel: _apply_head.1
= control target key start
LH: loop header
LB: loop body
LE: loop exit
PB: predicated region body
PF: predicated region fallthrough
CT: control target
= control target key end

     0   :  { %s328_s0 = inlined_call_operand.vmem [shape: f32[16,32], index: 0, kind: input, shape index: {}]   ;;  %s329_s1 = inlined_call_operand.hbm [shape: bf16[32,32], index: 1, kind: input, shape index: {}]   ;;  %s330_s2 = inlined_call_operand.vmem [shape: f32[1,32], index: 2, kind: input, shape index: {}]   ;;  %s331_s3 = inlined_call_operand.vmem [shape: bf16[32,1], index: 3, kind: input, shape index: {}]   ;;  %s332_s4 = inlined_call_operand.<no memory space> [shape: f32[1,1], index: 4, kind: input, shape index: {}]   ;;  %s333_s5 = inlined_call_operand.vmem [shape: f32[16,1], index: 5, kind: output, shape index: {}]  }
   0x1   :  { %v10_v0 = vstv %s332_s4 }
   0x2   :  { %11 = vst [vmem:[#allocation3] sm:$0x1] %v10_v0 }
   0x3   :  { %12 = vsyncpa [#allocation5], 0  ;;  %s254_s20 = smov [#allocation4]   ;;  %s230_s24 = scalar_lea.hbm %s329_s1, 256 }
   0x4   :  { %s20_s21 = sshll.u32 %s254_s20, 4  ;;  %p231_p0 = scmp.ne.s32.totalorder %s329_s1, %s230_s24  ;;  %s21_s21 = int_to_ptr.vmem [resolvable:$true] %s20_s21 }
   0x5   :  { %p234_p1 = scmp.lt.u32.totalorder %s230_s24, %s329_s1 }
   0x7   :  { %p236_p2 = pnand %p234_p1, %p231_p0 }
   0x9   :  { %239 = shalt.err (!%p236_p2)
}
   0xa   :  { %s240_s4 = scalar_lea.vmem %s21_s21, 256  ;;  %p245_p4 = scmp.lt.s32.totalorder %s21_s21, %s21_s21 }
   0xb   :  { %p241_p3 = scmp.ne.s32.totalorder %s21_s21, %s240_s4  ;;  %p246_p5 = scmp.lt.s32.totalorder %s240_s4, %s240_s4 }
   0xd   :  { %p247_p6 = por %p246_p5, %p245_p4 }
   0xf   :  { %p248_p7 = pnand %p247_p6, %p241_p3 }
  0x11   :  { %251 = shalt.err (!%p248_p7)
}
  0x12   :  { %s255_s29 = smov 64   ;;  %s256_s30 = smov 4  }
  0x13   :  { %26 = dma.hbm_to_vmem [thread:$0]  %s329_s1, 256, %s21_s21, [#allocation5], %s255_s29, %s255_s29, %s256_s30  }
  0x14   :  { %252 = dma.done.wait [#allocation5], 256  }
  0x15   :  { %253 = vsyncadd [#allocation5], 4294967040  ;;  %v257_v1 = vmov 0.0   ;;  %vm258_vm0 = vmmov 0   ;;  %v226_v2 = vld [vmem:[#allocation4] sm:$0xff]   ;;  %v227_v3 = vld [vmem:[#allocation4 + $0x8] sm:$0xff]  }
  0x16   :  { %205 = vmatprep.subr.bf16.mxu0 %v257_v1  ;;  %209 = vmatprep.mubr.msk.bf16.mxu0 %vm258_vm0, %v257_v1  ;;  %v41_v4 = vld [vmem:[%s328_s0] sm:$0xff]  ;;  %v42_v5 = vld [vmem:[%s328_s0 + $0x8] sm:$0xff]  ;;  %vm67_vm1 = vcmask 261120   ;;  %vm183_vm2 = vcmask 7168  }
  0x17   :  { %213 = vmatprep.subr.bf16.mxu1 %v257_v1  ;;  %217 = vmatprep.mubr.msk.bf16.mxu1 %vm258_vm0, %v257_v1  ;;  %v43_v6 = vpack.c.bf16 %v42_v5, %v41_v4  ;;  %v228_v7 = vld [vmem:[%s331_s3] sm:$0xff]   ;;  %v229_v8 = vld [vmem:[%s331_s3 + $0x8] sm:$0xff]  }
  0x18   :  { %206 = vmatpush3.bf16.msra.mxu0 %v226_v2  ;;  %214 = vmatpush3.bf16.msra.mxu1 %v228_v7  ;;  %v191_v9 = vld [vmem:[%s330_s2] ss:$0 sm:$0xff]  ;;  %v195_v18 = vld [vmem:[#allocation3] ss:$0 sm:$0xff] }
  0x19   :  { %207 = vmatprep.subr.bf16.mxu0 %v257_v1  ;;  %215 = vmatprep.subr.bf16.mxu1 %v257_v1 }
  0x1c   :  { %208 = vmatpush3.bf16.msra.mxu0 %v227_v3  ;;  %216 = vmatpush3.bf16.msra.mxu1 %v229_v8 }
  0x1f   :  { %210 = vmatmul.mubr.msk.bf16.vlgmr.msra.gmra.mrb[0].mxu0 %vm67_vm1, %v43_v6 }
  0xf2   :  { %v105_v10 = vpop.f32.mrb[0].mxu0 }
  0xf3   :  { %v211_v11 = vpop.f32.mrb[1].mxu0  ;;  %v106_v13 = vadd.f32 %v191_v9, %v105_v10 }
  0xf4   :  { %v108_v12 = vpop.f32.mrb[2].mxu0 }
  0xf5   :  { %v109_v14 = vadd.f32 %v191_v9, %v108_v12  ;;  %v212_v15 = vpop.f32.mrb[3].mxu0 }
  0xf7   :  { %v112_v16 = vpack.c.bf16 %v109_v14, %v106_v13 }
  0xf9   :  { %113 = vst.msk [vmem:[#allocation2] sm:$0xff] %vm67_vm1, %v112_v16 }
 0x100   :  { %v114_v17 = vld [vmem:[#allocation2] sm:$0xff] }
 0x101   :  { %218 = vmatmul.mubr.msk.bf16.vlgmr.msra.gmra.mrb[0].mxu1 %vm67_vm1, %v114_v17 }
 0x1d4   :  { %v176_v19 = vpop.f32.mrb[0].mxu1 }
 0x1d5   :  { %v177_v20 = vadd.f32 %v195_v18, %v176_v19  ;;  %v219_v21 = vpop.f32.mrb[1].mxu1 }
 0x1d6   :  { %v179_v22 = vpop.f32.mrb[2].mxu1 }
 0x1d7   :  { %184 = vst.msk [vmem:[%s333_s5] sm:$0xff] %vm183_vm2, %v177_v20  ;;  %v180_v23 = vadd.f32 %v195_v18, %v179_v22  ;;  %v220_v24 = vpop.f32.mrb[3].mxu1 }
 0x1d9   :  { %185 = vst.msk [vmem:[%s333_s5 + $0x8] sm:$0xff] %vm183_vm2, %v180_v23 }
 0x1da   :  { %190 = vsyncpa [#allocation5], 1 }

</bundles_post_ra>
